<compile_context>
chip_gen: v6e
topology: v6e:2x2x1
jax: 0.10.0
libtpu: 0.0.40
codegen_flags: <defaults>
</compile_context>

<pallas_src>
import functools
import math

import jax
import jax.numpy as jnp
from jax import lax
from jax.experimental import pallas as pl
from jax.experimental.pallas import tpu as pltpu


def _round_up(n, m):
    return ((n + m - 1) // m) * m


def _choose_tile(n, target):
    """Largest divisor of n that is <= target and a multiple of 8; else n.

    Returning n itself (the full dimension) always satisfies the (8,128)
    BlockSpec rule, so the fallback is legal instead of a lowering crash.
    """
    t = min(n, target)
    if t >= n:
        return n
    for c in range(t, 7, -1):
        if n % c == 0 and c % 8 == 0:
            return c
    return n


# ---------------------------------------------------------------------------
# Fused QKV projection + flash attention (online softmax) kernel.
# Grid: (B, q_tiles, kv_tiles); kv is the innermost "arbitrary" reduction axis.
# ---------------------------------------------------------------------------
def _fused_attention_kernel(xq_ref, xkv_ref, w_ref, b_ref, o_ref,
                            q_scr, m_scr, l_scr, acc_scr,
                            *, a_pad, a_out, scale, approx_recip):
    ki = pl.program_id(2)
    nk = pl.num_programs(2)

    @pl.when(ki == 0)
    def _init():
        # Q projection for this (batch, q-tile): done once, kept in VMEM.
        # The 1/sqrt(A) softmax scale is folded into Q here (free epilogue
        # work: tq*A_pad multiplies once instead of tq*tk per kv step).
        xq = xq_ref[0]                                            # (tq, F)
        q = jnp.dot(xq, w_ref[:, :a_pad],
                    preferred_element_type=jnp.float32)           # (tq, A_pad)
        q = (q + b_ref[:, :a_pad]) * scale
        q_scr[...] = q.astype(q_scr.dtype)
        m_scr[...] = jnp.full(m_scr.shape, -jnp.inf, dtype=m_scr.dtype)
        l_scr[...] = jnp.zeros(l_scr.shape, dtype=l_scr.dtype)
        acc_scr[...] = jnp.zeros(acc_scr.shape, dtype=acc_scr.dtype)

    # K/V projection for this kv tile: one fused (tk,F)@(F,2*A_pad) matmul,
    # f32 accumulation, bias in f32.  K/V never touch HBM.
    xkv = xkv_ref[0]                                              # (tk, F)
    kv = jnp.dot(xkv, w_ref[:, a_pad:],
                 preferred_element_type=jnp.float32)              # (tk, 2*A_pad)
    kv = kv + b_ref[:, a_pad:]
    k = kv[:, :a_pad].astype(xkv.dtype)    # lane-aligned (A_pad = 128*k) slices
    v = kv[:, a_pad:].astype(xkv.dtype)

    # QK^T: contract the last axis of both operands (no explicit transpose).
    q = q_scr[...]
    s = lax.dot_general(q, k, (((1,), (1,)), ((), ())),
                        preferred_element_type=jnp.float32)       # (tq, tk)

    # Online (streaming) softmax update; all elementwise math stays in f32.
    m_prev = m_scr[...]
    m_new = jnp.maximum(m_prev, jnp.max(s, axis=-1, keepdims=True))
    alpha = jnp.exp(m_prev - m_new)
    p = jnp.exp(s - m_new)                                        # unnormalized
    l_scr[...] = alpha * l_scr[...] + jnp.sum(p, axis=-1, keepdims=True)
    acc_scr[...] = alpha * acc_scr[...] + jnp.dot(
        p.astype(v.dtype), v, preferred_element_type=jnp.float32)
    m_scr[...] = m_new

    @pl.when(ki == nk - 1)
    def _finalize():
        # Deferred normalization: one reciprocal per row (EUP slot) plus
        # tq*A multiplies instead of tq*tk divides.
        inv_l = pl.reciprocal(l_scr[...], approx=approx_recip)
        out = acc_scr[...] * inv_l
        o_ref[0] = out[:, :a_out].astype(o_ref.dtype)


# ---------------------------------------------------------------------------
# Wrapper
# ---------------------------------------------------------------------------
def attention_fusion(x, wq, bq, wk, bk, wv, bv, *,
                     compute_dtype=jnp.bfloat16,
                     q_tile=256, kv_tile=256,
                     approx_reciprocal=True,
                     vmem_limit_bytes=None):
    """x: (B, S, F); wq/wk/wv: (F, A); bq/bk/bv: (A,). Returns (B, S, A) f32.

    compute_dtype is the MXU operand dtype (bf16 default: ~2x MXU throughput
    and half the x/W DMA bytes on v5e/v6e/v7x); accumulation and softmax math
    stay in f32.  Default 256 tiles fill the 256-wide v6e/v7x MXU; per-step
    VMEM stays ~1 MiB so v7x's 64 MiB VMEM is not a constraint.  On v7x both
    TensorCores get work as long as B * (S // q_tile) >= 2.
    """
    B, S, F = x.shape
    A = wq.shape[1]
    compute_dtype = jnp.dtype(compute_dtype)
    scale = 1.0 / math.sqrt(float(A))

    # Pad the attention dim to a lane multiple so in-kernel Q/K/V, QK^T and
    # p@V are lane-dense.  Zero-padded weight/bias columns contribute nothing.
    a_pad = _round_up(A, 128)

    def pad_w(w):
        return jnp.pad(w, ((0, 0), (0, a_pad - A))) if a_pad != A else w

    def pad_b(b):
        return jnp.pad(b, (0, a_pad - A)) if a_pad != A else b

    w_qkv = jnp.concatenate([pad_w(wq), pad_w(wk), pad_w(wv)], axis=1)
    w_qkv = w_qkv.astype(compute_dtype)                      # (F, 3*A_pad)
    b_qkv = jnp.concatenate([pad_b(bq), pad_b(bk), pad_b(bv)])
    b_qkv = b_qkv.reshape(1, 3 * a_pad).astype(jnp.float32)  # (1, 3*A_pad)

    x_c = x.astype(compute_dtype)

    tq = _choose_tile(S, q_tile)
    tk = _choose_tile(S, kv_tile)
    nq = S // tq
    nk = S // tk

    if vmem_limit_bytes is None:
        cb = compute_dtype.itemsize
        est = (2 * F * 3 * a_pad * cb          # fused weight (double-buffered)
               + 2 * 3 * a_pad * 4             # bias
               + 2 * (tq + tk) * F * cb        # x tiles (double-buffered)
               + 2 * tq * A * 4                # output tile
               + tq * a_pad * (cb + 4)         # Q + acc scratch
               + 2 * tq * 4                    # m, l scratch
               + (1 << 20))                    # headroom
        vmem_limit_bytes = int(min(max(2 * est, 32 << 20), 64 << 20))

    kernel = functools.partial(
        _fused_attention_kernel, a_pad=a_pad, a_out=A, scale=scale,
        approx_recip=bool(approx_reciprocal))

    # Note: the grid-invariant weight/bias blocks are fetched once (index_map
    # is constant); if their double-buffer allocation ever binds VMEM on v7x
    # at very large F, set pipeline_mode=pl.Buffered on those specs and sweep.
    out = pl.pallas_call(
        kernel,
        out_shape=jax.ShapeDtypeStruct((B, S, A), jnp.float32),
        grid_spec=pltpu.PrefetchScalarGridSpec(
            num_scalar_prefetch=0,
            grid=(B, nq, nk),
            in_specs=[
                pl.BlockSpec((1, tq, F), lambda b, qi, ki: (b, qi, 0)),   # x (Q rows)
                pl.BlockSpec((1, tk, F), lambda b, qi, ki: (b, ki, 0)),   # x (K/V rows)
                pl.BlockSpec((F, 3 * a_pad), lambda b, qi, ki: (0, 0)),   # fused W
                pl.BlockSpec((1, 3 * a_pad), lambda b, qi, ki: (0, 0)),   # fused bias
            ],
            out_specs=pl.BlockSpec((1, tq, A), lambda b, qi, ki: (b, qi, 0)),
            scratch_shapes=[
                pltpu.VMEM((tq, a_pad), compute_dtype),   # scaled Q tile
                pltpu.VMEM((tq, 1), jnp.float32),         # running max  m
                pltpu.VMEM((tq, 1), jnp.float32),         # running sum  l
                pltpu.VMEM((tq, a_pad), jnp.float32),     # unnormalized context
            ],
        ),
        compiler_params=pltpu.CompilerParams(
            dimension_semantics=("parallel", "parallel", "arbitrary"),
            vmem_limit_bytes=vmem_limit_bytes),
    )(x_c, x_c, w_qkv, b_qkv)
    return out


def _reference(x, wq, bq, wk, bk, wv, bv):
    # Pure-JAX reference mirroring the PyTorch forward.
    q = x @ wq + bq
    k = x @ wk + bk
    v = x @ wv + bv
    scores = jnp.einsum("bsa,bta->bst", q, k) / math.sqrt(wq.shape[1])
    probs = jax.nn.softmax(scores, axis=-1)
    return jnp.einsum("bst,bta->bsa", probs, v)


if __name__ == "__main__":
    # Small shapes consistent with the module: batch=2, seq=8,
    # feature_dim=32, attention_dim=32.
    B, S, F, A = 2, 8, 32, 32

    key = jax.random.PRNGKey(0)
    kx, kwq, kbq, kwk, kbk, kwv, kbv = jax.random.split(key, 7)

    x = jax.random.normal(kx, (B, S, F), dtype=jnp.float32)

    # Deterministic parameter init (uniform like nn.Linear's default range).
    bound = 1.0 / math.sqrt(F)
    wq = jax.random.uniform(kwq, (F, A), jnp.float32, -bound, bound)
    bq = jax.random.uniform(kbq, (A,), jnp.float32, -bound, bound)
    wk = jax.random.uniform(kwk, (F, A), jnp.float32, -bound, bound)
    bk = jax.random.uniform(kbk, (A,), jnp.float32, -bound, bound)
    wv = jax.random.uniform(kwv, (F, A), jnp.float32, -bound, bound)
    bv = jax.random.uniform(kbv, (A,), jnp.float32, -bound, bound)

    ref = _reference(x, wq, bq, wk, bk, wv, bv)

    # f32 operands + exact reciprocal: tight correctness check.
    out_f32 = jax.block_until_ready(
        attention_fusion(x, wq, bq, wk, bk, wv, bv,
                         compute_dtype=jnp.float32,
                         approx_reciprocal=False))
    assert out_f32.shape == (B, S, A)
    assert jnp.allclose(out_f32, ref, atol=1e-4, rtol=1e-4), \
        "f32 path mismatch vs reference"

    # Production defaults (bf16 MXU operands, approx reciprocal): looser
    # tolerance from bf16 rounding.
    out_prod = jax.block_until_ready(
        attention_fusion(x, wq, bq, wk, bk, wv, bv))
    assert out_prod.shape == (B, S, A)
    assert jnp.allclose(out_prod, ref, atol=3e-2, rtol=3e-2), \
        "bf16 path mismatch vs reference"

    print("KERNEL_OK")
</pallas_src>

<mosaic_0001>
module attributes {stable_mosaic.version = 11 : i64} {
  func.func @_fused_attention_kernel(%arg0: i32, %arg1: i32, %arg2: i32, %arg3: memref<1x8x32xf32, #tpu.memory_space<vmem>>, %arg4: memref<1x8x32xf32, #tpu.memory_space<vmem>>, %arg5: memref<32x384xf32, #tpu.memory_space<vmem>>, %arg6: memref<1x384xf32, #tpu.memory_space<vmem>>, %arg7: memref<1x8x32xf32, #tpu.memory_space<vmem>>, %arg8: memref<8x128xf32, #tpu.memory_space<vmem>>, %arg9: memref<8x1xf32, #tpu.memory_space<vmem>>, %arg10: memref<8x1xf32, #tpu.memory_space<vmem>>, %arg11: memref<8x128xf32, #tpu.memory_space<vmem>>) attributes {dimension_semantics = [#tpu.dimension_semantics<parallel>, #tpu.dimension_semantics<parallel>, #tpu.dimension_semantics<arbitrary>], iteration_bounds = array<i64: 2, 1, 1>, scalar_prefetch = 0 : i64, scratch_operands = 4 : i64, tpu.core_type = #tpu.core_type<tc>, window_params = [{transform_indices = @transform_0, window_bounds = array<i64: 1, 8, 32>}, {transform_indices = @transform_1, window_bounds = array<i64: 1, 8, 32>}, {pipeline_mode = #tpu.pipeline_mode<synchronous>, transform_indices = @transform_2, window_bounds = array<i64: 32, 384>}, {pipeline_mode = #tpu.pipeline_mode<synchronous>, transform_indices = @transform_3, window_bounds = array<i64: 1, 384>}, {transform_indices = @transform_4, window_bounds = array<i64: 1, 8, 32>}]} {
    %c0_i32 = arith.constant 0 : i32
    %0 = arith.cmpi eq, %arg2, %c0_i32 : i32
    %1 = arith.extui %0 : i1 to i32
    %c0_i32_0 = arith.constant 0 : i32
    %2 = arith.cmpi ne, %1, %c0_i32_0 : i32
    scf.if %2 {
      %c0_26 = arith.constant 0 : index
      %c0_27 = arith.constant 0 : index
      %c0_28 = arith.constant 0 : index
      %39 = vector.load %arg3[%c0_26, %c0_27, %c0_28] : memref<1x8x32xf32, #tpu.memory_space<vmem>>, vector<1x8x32xf32>
      %40 = vector.shape_cast %39 : vector<1x8x32xf32> to vector<8x32xf32>
      %c0_29 = arith.constant 0 : index
      %c0_30 = arith.constant 0 : index
      %41 = vector.load %arg5[%c0_29, %c0_30] : memref<32x384xf32, #tpu.memory_space<vmem>>, vector<32x128xf32>
      %cst_31 = arith.constant dense<0.000000e+00> : vector<8x128xf32>
      %42 = tpu.matmul %40, %41, %cst_31 {dimension_numbers = #tpu.dot_dimension_numbers<[1], [0], [0], [1], [0, 0, 1, 1], [], []>} : vector<8x32xf32>, vector<32x128xf32>, vector<8x128xf32> -> vector<8x128xf32>
      %c0_32 = arith.constant 0 : index
      %c0_33 = arith.constant 0 : index
      %43 = vector.load %arg6[%c0_32, %c0_33] : memref<1x384xf32, #tpu.memory_space<vmem>>, vector<1x128xf32>
      %44 = vector.broadcast %43 : vector<1x128xf32> to vector<8x128xf32>
      %45 = arith.addf %42, %44 : vector<8x128xf32>
      %cst_34 = arith.constant 0.176776692 : f32
      %46 = vector.broadcast %cst_34 : f32 to vector<8x128xf32>
      %47 = arith.mulf %45, %46 : vector<8x128xf32>
      %c0_35 = arith.constant 0 : index
      %c0_36 = arith.constant 0 : index
      %48 = vector.load %arg8[%c0_35, %c0_36] : memref<8x128xf32, #tpu.memory_space<vmem>>, vector<8x128xf32>
      tpu.vector_store %arg8[%c0_35, %c0_36], %47 {strides = array<i32>} : memref<8x128xf32, #tpu.memory_space<vmem>>, vector<8x128xf32>,
      %cst_37 = arith.constant 0xFF800000 : f32
      %49 = vector.broadcast %cst_37 : f32 to vector<8x1xf32>
      %c0_38 = arith.constant 0 : index
      %c0_39 = arith.constant 0 : index
      %50 = vector.load %arg9[%c0_38, %c0_39] : memref<8x1xf32, #tpu.memory_space<vmem>>, vector<8x1xf32>
      tpu.vector_store %arg9[%c0_38, %c0_39], %49 {strides = array<i32>} : memref<8x1xf32, #tpu.memory_space<vmem>>, vector<8x1xf32>,
      %cst_40 = arith.constant 0.000000e+00 : f32
      %51 = vector.broadcast %cst_40 : f32 to vector<8x1xf32>
      %c0_41 = arith.constant 0 : index
      %c0_42 = arith.constant 0 : index
      %52 = vector.load %arg10[%c0_41, %c0_42] : memref<8x1xf32, #tpu.memory_space<vmem>>, vector<8x1xf32>
      tpu.vector_store %arg10[%c0_41, %c0_42], %51 {strides = array<i32>} : memref<8x1xf32, #tpu.memory_space<vmem>>, vector<8x1xf32>,
      %cst_43 = arith.constant 0.000000e+00 : f32
      %53 = vector.broadcast %cst_43 : f32 to vector<8x128xf32>
      %c0_44 = arith.constant 0 : index
      %c0_45 = arith.constant 0 : index
      %54 = vector.load %arg11[%c0_44, %c0_45] : memref<8x128xf32, #tpu.memory_space<vmem>>, vector<8x128xf32>
      tpu.vector_store %arg11[%c0_44, %c0_45], %53 {strides = array<i32>} : memref<8x128xf32, #tpu.memory_space<vmem>>, vector<8x128xf32>,
    } else {
    }
    %c0 = arith.constant 0 : index
    %c0_1 = arith.constant 0 : index
    %c0_2 = arith.constant 0 : index
    %3 = vector.load %arg4[%c0, %c0_1, %c0_2] : memref<1x8x32xf32, #tpu.memory_space<vmem>>, vector<1x8x32xf32>
    %4 = vector.shape_cast %3 : vector<1x8x32xf32> to vector<8x32xf32>
    %c0_3 = arith.constant 0 : index
    %c128 = arith.constant 128 : index
    %5 = vector.load %arg5[%c0_3, %c128] : memref<32x384xf32, #tpu.memory_space<vmem>>, vector<32x256xf32>
    %cst = arith.constant dense<0.000000e+00> : vector<8x256xf32>
    %6 = tpu.matmul %4, %5, %cst {dimension_numbers = #tpu.dot_dimension_numbers<[1], [0], [0], [1], [0, 0, 1, 1], [], []>} : vector<8x32xf32>, vector<32x256xf32>, vector<8x256xf32> -> vector<8x256xf32>
    %c0_4 = arith.constant 0 : index
    %c128_5 = arith.constant 128 : index
    %7 = vector.load %arg6[%c0_4, %c128_5] : memref<1x384xf32, #tpu.memory_space<vmem>>, vector<1x256xf32>
    %8 = vector.broadcast %7 : vector<1x256xf32> to vector<8x256xf32>
    %9 = arith.addf %6, %8 : vector<8x256xf32>
    %10 = vector.extract_strided_slice %9 {offsets = [0, 0], sizes = [8, 128], strides = [1, 1]} : vector<8x256xf32> to vector<8x128xf32>
    %11 = vector.extract_strided_slice %9 {offsets = [0, 128], sizes = [8, 128], strides = [1, 1]} : vector<8x256xf32> to vector<8x128xf32>
    %c0_6 = arith.constant 0 : index
    %c0_7 = arith.constant 0 : index
    %12 = vector.load %arg8[%c0_6, %c0_7] : memref<8x128xf32, #tpu.memory_space<vmem>>, vector<8x128xf32>
    %cst_8 = arith.constant dense<0.000000e+00> : vector<8x8xf32>
    %13 = tpu.matmul %12, %10, %cst_8 {dimension_numbers = #tpu.dot_dimension_numbers<[1], [1], [0], [0], [0, 0, 1, 0], [], []>} : vector<8x128xf32>, vector<8x128xf32>, vector<8x8xf32> -> vector<8x8xf32>
    %c0_9 = arith.constant 0 : index
    %c0_10 = arith.constant 0 : index
    %14 = vector.load %arg9[%c0_9, %c0_10] : memref<8x1xf32, #tpu.memory_space<vmem>>, vector<8x1xf32>
    %cst_11 = arith.constant dense<0xFF800000> : vector<8xf32>
    %15 = vector.multi_reduction <maximumf>, %13, %cst_11 [1] : vector<8x8xf32> to vector<8xf32>
    %16 = vector.shape_cast %15 : vector<8xf32> to vector<8x1xf32>
    %17 = arith.maximumf %14, %16 : vector<8x1xf32>
    %18 = arith.subf %14, %17 : vector<8x1xf32>
    %19 = math.exp %18 : vector<8x1xf32>
    %20 = vector.broadcast %17 : vector<8x1xf32> to vector<8x8xf32>
    %21 = arith.subf %13, %20 : vector<8x8xf32>
    %22 = math.exp %21 : vector<8x8xf32>
    %c0_12 = arith.constant 0 : index
    %c0_13 = arith.constant 0 : index
    %23 = vector.load %arg10[%c0_12, %c0_13] : memref<8x1xf32, #tpu.memory_space<vmem>>, vector<8x1xf32>
    %24 = arith.mulf %19, %23 : vector<8x1xf32>
    %cst_14 = arith.constant dense<0.000000e+00> : vector<8xf32>
    %25 = vector.multi_reduction <add>, %22, %cst_14 [1] : vector<8x8xf32> to vector<8xf32>
    %26 = vector.shape_cast %25 : vector<8xf32> to vector<8x1xf32>
    %27 = arith.addf %24, %26 : vector<8x1xf32>
    %c0_15 = arith.constant 0 : index
    %c0_16 = arith.constant 0 : index
    %28 = vector.load %arg10[%c0_15, %c0_16] : memref<8x1xf32, #tpu.memory_space<vmem>>, vector<8x1xf32>
    tpu.vector_store %arg10[%c0_15, %c0_16], %27 {strides = array<i32>} : memref<8x1xf32, #tpu.memory_space<vmem>>, vector<8x1xf32>,
    %c0_17 = arith.constant 0 : index
    %c0_18 = arith.constant 0 : index
    %29 = vector.load %arg11[%c0_17, %c0_18] : memref<8x128xf32, #tpu.memory_space<vmem>>, vector<8x128xf32>
    %30 = vector.broadcast %19 : vector<8x1xf32> to vector<8x128xf32>
    %31 = arith.mulf %30, %29 : vector<8x128xf32>
    %cst_19 = arith.constant dense<0.000000e+00> : vector<8x128xf32>
    %32 = tpu.matmul %22, %11, %cst_19 {dimension_numbers = #tpu.dot_dimension_numbers<[1], [0], [0], [1], [0, 0, 1, 1], [], []>} : vector<8x8xf32>, vector<8x128xf32>, vector<8x128xf32> -> vector<8x128xf32>
    %33 = arith.addf %31, %32 : vector<8x128xf32>
    %c0_20 = arith.constant 0 : index
    %c0_21 = arith.constant 0 : index
    %34 = vector.load %arg11[%c0_20, %c0_21] : memref<8x128xf32, #tpu.memory_space<vmem>>, vector<8x128xf32>
    tpu.vector_store %arg11[%c0_20, %c0_21], %33 {strides = array<i32>} : memref<8x128xf32, #tpu.memory_space<vmem>>, vector<8x128xf32>,
    %c0_22 = arith.constant 0 : index
    %c0_23 = arith.constant 0 : index
    %35 = vector.load %arg9[%c0_22, %c0_23] : memref<8x1xf32, #tpu.memory_space<vmem>>, vector<8x1xf32>
    tpu.vector_store %arg9[%c0_22, %c0_23], %17 {strides = array<i32>} : memref<8x1xf32, #tpu.memory_space<vmem>>, vector<8x1xf32>,
    %c0_i32_24 = arith.constant 0 : i32
    %36 = arith.cmpi eq, %arg2, %c0_i32_24 : i32
    %37 = arith.extui %36 : i1 to i32
    %c0_i32_25 = arith.constant 0 : i32
    %38 = arith.cmpi ne, %37, %c0_i32_25 : i32
    scf.if %38 {
      %c0_26 = arith.constant 0 : index
      %c0_27 = arith.constant 0 : index
      %39 = vector.load %arg10[%c0_26, %c0_27] : memref<8x1xf32, #tpu.memory_space<vmem>>, vector<8x1xf32>
      %40 = tpu.reciprocal %39 : vector<8x1xf32> -> vector<8x1xf32>
      %c0_28 = arith.constant 0 : index
      %c0_29 = arith.constant 0 : index
      %41 = vector.load %arg11[%c0_28, %c0_29] : memref<8x128xf32, #tpu.memory_space<vmem>>, vector<8x128xf32>
      %42 = vector.broadcast %40 : vector<8x1xf32> to vector<8x128xf32>
      %43 = arith.mulf %41, %42 : vector<8x128xf32>
      %44 = vector.extract_strided_slice %43 {offsets = [0, 0], sizes = [8, 32], strides = [1, 1]} : vector<8x128xf32> to vector<8x32xf32>
      %c0_30 = arith.constant 0 : index
      %c0_31 = arith.constant 0 : index
      %c0_32 = arith.constant 0 : index
      %45 = vector.load %arg7[%c0_30, %c0_31, %c0_32] : memref<1x8x32xf32, #tpu.memory_space<vmem>>, vector<1x8x32xf32>
      %46 = vector.shape_cast %45 : vector<1x8x32xf32> to vector<8x32xf32>
      %47 = vector.shape_cast %44 : vector<8x32xf32> to vector<1x8x32xf32>
      tpu.vector_store %arg7[%c0_30, %c0_31, %c0_32], %47 {strides = array<i32>} : memref<1x8x32xf32, #tpu.memory_space<vmem>>, vector<1x8x32xf32>,
    } else {
    }
    return
  }
  func.func @transform_0(%arg0: i32, %arg1: i32, %arg2: i32) -> (i32, i32, i32) {
    %c0_i32 = arith.constant 0 : i32
    %c0_i32_0 = arith.constant 0 : i32
    return %arg0, %arg1, %c0_i32 : i32, i32, i32
  }
  func.func @transform_1(%arg0: i32, %arg1: i32, %arg2: i32) -> (i32, i32, i32) {
    %c0_i32 = arith.constant 0 : i32
    %c0_i32_0 = arith.constant 0 : i32
    return %arg0, %arg2, %c0_i32 : i32, i32, i32
  }
  func.func @transform_2(%arg0: i32, %arg1: i32, %arg2: i32) -> (i32, i32) {
    %c0_i32 = arith.constant 0 : i32
    %c0_i32_0 = arith.constant 0 : i32
    %c0_i32_1 = arith.constant 0 : i32
    return %c0_i32, %c0_i32_0 : i32, i32
  }
  func.func @transform_3(%arg0: i32, %arg1: i32, %arg2: i32) -> (i32, i32) {
    %c0_i32 = arith.constant 0 : i32
    %c0_i32_0 = arith.constant 0 : i32
    %c0_i32_1 = arith.constant 0 : i32
    return %c0_i32, %c0_i32_0 : i32, i32
  }
  func.func @transform_4(%arg0: i32, %arg1: i32, %arg2: i32) -> (i32, i32, i32) {
    %c0_i32 = arith.constant 0 : i32
    %c0_i32_0 = arith.constant 0 : i32
    return %arg0, %arg1, %c0_i32 : i32, i32, i32
  }
}

</mosaic_0001>

<bundles_post_ra>
// kernel: tpu_custom_call.1
= control target key start
LH: loop header
LB: loop body
LE: loop exit
PB: predicated region body
PF: predicated region fallthrough
CT: control target
= control target key end

     0   :  { %s1379_s0 = inlined_call_operand.hbm [shape: f32[2,8,32], index: 0, kind: input, shape index: {}]   ;;  %s1380_s1 = inlined_call_operand.hbm [shape: f32[2,8,32], index: 1, kind: input, shape index: {}]   ;;  %s1381_s2 = inlined_call_operand.hbm [shape: f32[32,384], index: 2, kind: input, shape index: {}]   ;;  %s1382_s3 = inlined_call_operand.vmem [shape: f32[1,384], index: 3, kind: input, shape index: {}]   ;;  %s1383_s4 = inlined_call_operand.hbm [shape: f32[2,8,32], index: 4, kind: output, shape index: {}]  }
   0x1   :  { %1385 = sst [smem:[#allocation18_spill]] %s1381_s2 }
   0x2   :  { %9 = vsyncpa [#allocation7], 0 }
   0x3   :  { %11 = vsyncpa [#allocation7 + $0x1], 0 }
   0x4   :  { %12 = vsyncpa [#allocation10], 0 }
   0x5   :  { %14 = vsyncpa [#allocation10 + $0x1], 0 }
   0x6   :  { %15 = vsyncpa [#allocation8], 0 }
   0x7   :  { %17 = vsyncpa [#allocation8 + $0x1], 0  ;;  %s1157_s15 = smov 0   ;;  %s1159_s16 = smov 0  }
   0x8   :  { %s1161_s17 = smov 0   ;;  %s1163_s18 = smov 0  }
   0x9   :  { %s1165_s19 = smov 0   ;;  %s1167_s20 = smov 0  }
   0xa LB: > { %s1188_s21 = sadd.s32 4294967295, %s1120_s20   ;;  %s807_s22 = sadd.s32 4294967294, %s1120_s20   ;;  %s1120_s20 = sphi %s1167_s20, %s23_s20   ;;  %s1116_s19 = sphi %s1165_s19, %s1403_s19   ;;  %s1112_s18 = sphi %s1163_s18, %s1402_s18   ;;  %s1108_s17 = sphi %s1161_s17, %s1401_s17   ;;  %s1104_s16 = sphi %s1159_s16, %s1400_s16   ;;  %s1100_s15 = sphi %s1157_s15, %s1399_s15  }
   0xb   : > { %p64_p0 = scmp.ne.s32.totalorder %s1104_s16, %s1100_s15  ;;  %p65_p1 = scmp.eq.s32.totalorder %s1188_s21, 0 }
   0xc   : > { %p166_p3 = scmp.eq.s32.totalorder %s807_s22, 1  ;;  %p808_p5 = scmp.ge.s32.totalorder %s1120_s20, 1 }
   0xd   : > { %p1197_p4 = por %p65_p1, %p64_p0  ;;  %p173_p7 = scmp.lt.s32.totalorder %s1120_s20, 3 }
   0xe   : > { %p1202_p6 = por %p166_p3, %p64_p0  ;;  %s1122_s26 = smov [#allocation11]  }
   0xf   : > { %p1207_p8 = pnand %p808_p5, %p173_p7  ;;  %s185_s27 = sshll.u32 %s1122_s26, 4  ;;  %s186_s27 = int_to_ptr.vmem [resolvable:$true] %s185_s27 }
  0x10   : > { %s1387_s24 = scalar_select %p1202_p6, 1, 0 }
  0x11   : > { %p868_p9 = pneg %p1207_p8  ;;  %s42_s29 = sadd.s32 1, %s1116_s19 }
  0x12   : > { %s961_s30 = scalar_lea.vmem %s186_s27, 1536  ;;  %p969_p5 = scmp.lt.s32.totalorder %s186_s27, %s186_s27 }
  0x13   : > { %p1216_p11 = pnand %p868_p9, %p65_p1  ;;  %p962_p13 = scmp.ne.s32.totalorder %s186_s27, %s961_s30 }
  0x14   : > { %p970_p7 = scmp.lt.s32.totalorder %s961_s30, %s961_s30 }
  0x15   : > { %p952_p12 = pneg %p1216_p11 }
  0x16   : > { %p971_p2 = por %p970_p7, %p969_p5 }
  0x17   : > { %p964_p0 = pnand %p962_p13, %p952_p12 }
  0x19   : > { %p965_p3 = pneg %p964_p0 }
  0x1b   : > { %p972_p6 = pnand %p971_p2, %p965_p3 }
  0x1d   : > { %975 = shalt.err (!%p972_p6)
}
  0x1e   : > { %s1123_s5 = smov 384   ;;  %s1124_s6 = smov 24  }
  0x1f   : > { %s1390_s2 = sld [smem:[#allocation18_spill]]  ;;  %p44_p2 = scmp.ge.s32.totalorder %s42_s29, 2 }
  0x20   : > { %s51_s9 = sadd.s32 1, %s1108_s17  ;;  %p58_p6 = scmp.ne.s32.totalorder %s1108_s17, %s1104_s16 }
  0x21   : > { %p59_p9 = scmp.eq.s32.totalorder %s1120_s20, 0  ;;  %s1405_s29 = smov (%p44_p2, %s42_s29), 0 }
  0x22   : > { %1391 = sst [smem:[#allocation17_spill]] %s1405_s29  ;;  %p1393_p13 = scmp.eq.s32.totalorder %s1188_s21, 1 }
  0x23   : > { %p1234_p12 = por %p59_p9, %p58_p6  ;;  %s46_s12 = ssub.s32 %s1116_s19, %s1405_s29 }
  0x24   : > { %p1240_p0 = por %p1393_p13, %p58_p6  ;;  %p49_p3 = scmp.eq.s32.totalorder %s46_s12, 0 }
  0x25   : > { %871 = dma.hbm_to_vmem [thread:$0]  (!%p1216_p11), %s1390_s2, 1536, %s186_s27, [#allocation10], %s1123_s5, %s1123_s5, %s1124_s6  }
  0x26   : > { %p884_p11 = scmp.lt.s32.totalorder %s1120_s20, 2  ;;  %s202_s13 = sand.u32 1, %s1108_s17  }
  0x27   : > { %s811_s14 = sshll.u32 %s202_s13, 3  ;;  %s812_s26 = sshll.u32 %s1116_s19, 7 }
  0x28   : > { %s1249_s22 = scalar_select %p49_p3, %s1108_s17, %s51_s9  }
  0x29   : > { %s212_s30 = scalar_lea.hbm %s1379_s0, %s812_s26  ;;  %s206_s5 = scalar_lea.vmem [#allocation6], %s811_s14 }
  0x2a   : > { %s214_s6 = sshll.u32 %s206_s5, 4  ;;  %p1257_p5 = pnand %p884_p11, %p1234_p12  ;;  %s215_s6 = int_to_ptr.vmem [resolvable:$true] %s214_s6 }
  0x2b   : > { %s1264_s9 = scalar_lea.hbm %s1380_s1, %s812_s26  ;;  %s221_s12 = sand.u32 1, %s1120_s20  }
  0x2c   : > { %s203_s29 = scalar_lea.sflag [#allocation7], %s202_s13  ;;  %p978_p7 = pneg %p1257_p5 }
  0x2d   : > { %s989_s27 = scalar_lea.vmem %s215_s6, 128  ;;  %s1125_s10 = smov [#allocation6]  }
  0x2e   : > { %p990_p2 = scmp.ne.s32.totalorder %s215_s6, %s989_s27  ;;  %s994_s28 = sshll.u32 %s1125_s10, 4  ;;  %s995_s28 = int_to_ptr.vmem [resolvable:$false] %s994_s28 }
  0x2f   : > { %s996_s5 = scalar_lea.vmem %s995_s28, 256  ;;  %p997_p12 = scmp.lt.s32.totalorder %s215_s6, %s995_s28 }
  0x30   : > { %p992_p6 = pnand %p990_p2, %p978_p7  ;;  %p998_p13 = scmp.lt.s32.totalorder %s996_s5, %s989_s27 }
  0x32   : > { %p993_p9 = pneg %p992_p6  ;;  %p999_p11 = por %p998_p13, %p997_p12 }
  0x34   : > { %p1000_p3 = pnand %p999_p11, %p993_p9 }
  0x36   : > { %1003 = shalt.err (!%p1000_p3)
}
  0x37   : > { %875 = dma.hbm_to_vmem [thread:$0]  (!%p1257_p5), %s212_s30, 128, %s215_s6, %s203_s29  }
  0x38   : > { %s225_s2 = scalar_lea.vmem [#allocation9], %s811_s14  ;;  %s222_s26 = scalar_lea.sflag [#allocation10], %s221_s12 }
  0x39   : > { %s233_s13 = sshll.u32 %s225_s2, 4  ;;  %s1126_s10 = smov [#allocation9]   ;;  %s234_s13 = int_to_ptr.vmem [resolvable:$true] %s233_s13 }
  0x3a   : > { %s1017_s8 = scalar_lea.vmem %s234_s13, 128  ;;  %s1022_s28 = sshll.u32 %s1126_s10, 4  ;;  %s1023_s28 = int_to_ptr.vmem [resolvable:$false] %s1022_s28 }
  0x3b   : > { %p1018_p2 = scmp.ne.s32.totalorder %s234_s13, %s1017_s8  ;;  %s1024_s27 = scalar_lea.vmem %s1023_s28, 256 }
  0x3c   : > { %p1025_p9 = scmp.lt.s32.totalorder %s234_s13, %s1023_s28  ;;  %p1026_p12 = scmp.lt.s32.totalorder %s1024_s27, %s1017_s8 }
  0x3d   : > { %p1020_p6 = pnand %p1018_p2, %p978_p7 }
  0x3e   : > { %p1027_p13 = por %p1026_p12, %p1025_p9 }
  0x3f   : > { %p1021_p10 = pneg %p1020_p6 }
  0x41   : > { %p1028_p11 = pnand %p1027_p13, %p1021_p10 }
  0x43   : > { %1031 = shalt.err (!%p1028_p11)
}
  0x44   : > { %878 = dma.hbm_to_vmem [thread:$0]  (!%p1257_p5), %s1264_s9, 128, %s234_s13, %s222_s26  }
  0x45   : > { %242 = sbr.rel (%p1207_p8) target bundleno = 1066 (0x42a), region = 36  ;;  %s1283_s29 = sand.u32 (!%p1207_p8), 1, %s1104_s16  }
  0x46   : > { %s1286_s14 = sshll.u32 (!%p1207_p8), %s1283_s29, 3  ;;  %s245_s30 = scalar_lea.sflag (!%p1207_p8), [#allocation7], %s1283_s29 }
  0x47   : > { %s248_s6 = scalar_lea.vmem (!%p1207_p8), [#allocation6], %s1286_s14 }
  0x4a   : > { %1083 = dma.done.wait (%p1197_p4), %s245_s30, 128  }
  0x4b   : > { %1085 = vsyncadd (%p1197_p4), %s245_s30, 4294967168  ;;  %s253_s25 = sand.u32 1, %s1188_s21   ;;  %s257_s9 = scalar_lea.vmem [#allocation9], %s1286_s14 }
  0x4c   : > { %s254_s7 = scalar_lea.sflag [#allocation10], %s253_s25 }
  0x4d   : > { %1087 = dma.done.wait (%p1197_p4), %s254_s7, 128  }
  0x4e   : > { %1089 = vsyncadd (%p1197_p4), %s254_s7, 4294967168 }
  0x4f   : > { %1091 = dma.done.wait (%p65_p1), [#allocation10], 1536  }
  0x50   : > { %1093 = vsyncadd (%p65_p1), [#allocation10], 4294965760  ;;  %v1127_v0 = vmov 0.0   ;;  %vm1128_vm0 = vmmov 0   ;;  %v395_v1 = vld [vmem:[#allocation11 + $0x58] sm:$0xff]  ;;  %v299_v2 = vld [vmem:[#allocation11 + $0x48] sm:$0xff]  ;;  %v398_v15 = vlaneseq }
  0x51   : > { %837 = vmatprep.subr.mxu0 %v1127_v0  ;;  %845 = vmatprep.mubr.msk.f32.mxu0 %vm1128_vm0, %v1127_v0  ;;  %v394_v3 = vld [vmem:[#allocation11 + $0x50] sm:$0xff]  ;;  %v393_v4 = vld [vmem:[#allocation11 + $0x40] sm:$0xff]  ;;  %v392_v6 = vld [vmem:[#allocation11 + $0x38] sm:$0xff]  ;;  %vm307_vm1 = vcmask 261120   ;;  %vm383_vm2 = vcmask 7168   ;;  %v1129_v31 = vmov -inf  }
  0x52   : > { %476 = vmatprep.mubr.f32.mxu1 %v1127_v0  ;;  %436 = vmatprep.subr.mxu1 %v395_v1  ;;  %v298_v5 = vld [vmem:[#allocation11 + $0x30] sm:$0xff]  ;;  %v391_v7 = vld [vmem:[#allocation11 + $0x28] sm:$0xff]  ;;  %v297_v8 = vld [vmem:[#allocation11 + $0x18] sm:$0xff]  ;;  %v399_v16 = vshrl.u32 %v398_v15, 7  ;;  %384 = vst.msk [vmem:[#allocation3] sm:$0xff] %vm383_vm2, %v1129_v31  ;;  %vm555_vm3 = vcmask 64512  }
  0x53   : > { %838 = vmatpush3.msra.mxu0 %v299_v2  ;;  %437 = vmatpush1.msra.mxu1 %v394_v3  ;;  %v390_v9 = vld [vmem:[#allocation11 + $0x20] sm:$0xff]  ;;  %v389_v10 = vld [vmem:[#allocation11 + $0x10] sm:$0xff]  ;;  %v388_v12 = vld [vmem:[#allocation11 + $0x8] sm:$0xff]  ;;  %385 = vst.msk [vmem:[#allocation4] sm:$0xff] %vm383_vm2, %v1127_v0  ;;  %v1130_v35 = vmov 0   ;;  %s825_s2 = sshll.u32 %s1112_s18, 7 }
  0x54   : > { %839 = vmatprep.subr.mxu0 %v1127_v0  ;;  %438 = vmatprep.subr.mxu1 %v393_v4  ;;  %v296_v11 = vld [vmem:[#allocation11] sm:$0xff]  ;;  %v387_v14 = vld [vmem:[%s257_s9] sm:$0xff]  ;;  %v400_v17 = vsub.s32 0, %v399_v16  ;;  %v404_v19 = vsub.s32 1, %v399_v16  ;;  %s290_s13 = scalar_lea.vmem [#allocation12], %s1286_s14  ;;  %s688_s28 = scalar_lea.hbm %s1383_s4, %s825_s2 }
  0x55   : > { %840 = vmatpush3.msra.mxu0 %v298_v5  ;;  %439 = vmatpush1.msra.mxu1 %v392_v6  ;;  %v295_v13 = vld [vmem:[%s248_s6] sm:$0xff]  ;;  %v396_v18 = vld [vmem:[%s1382_s3 + $0x1] sm:$0x3]  ;;  %v820_v20 = vld [vmem:[%s1382_s3] ss:$0 sm:$0xff]  ;;  %s690_s26 = sshll.u32 %s290_s13, 4  ;;  %s691_s26 = int_to_ptr.vmem [resolvable:$true] %s690_s26 }
  0x56   : > { %841 = vmatprep.subr.mxu0 %v1127_v0  ;;  %440 = vmatprep.subr.mxu1 %v391_v7  ;;  %v401_v21 = vrot.slane %v396_v18, %v400_v17  ;;  %v405_v23 = vrot.slane %v396_v18, %v404_v19  ;;  %s676_s27 = scalar_lea.sflag [#allocation8], %s1283_s29  ;;  %s1032_s30 = scalar_lea.vmem %s691_s26, 128 }
  0x57   : > { %842 = vmatpush3.msra.mxu0 %v297_v8  ;;  %441 = vmatpush1.msra.mxu1 %v390_v9  ;;  %p1033_p1 = scmp.ne.s32.totalorder %s691_s26, %s1032_s30  ;;  %s1131_s6 = smov [#allocation12]  }
  0x58   : > { %843 = vmatprep.subr.mxu0 %v1127_v0  ;;  %442 = vmatprep.subr.mxu1 %v389_v10  ;;  %s1036_s18 = sshll.u32 %s1131_s6, 4  ;;  %s1037_s18 = int_to_ptr.vmem [resolvable:$false] %s1036_s18 }
  0x59   : > { %844 = vmatpush3.msra.mxu0 %v296_v11  ;;  %443 = vmatpush1.msra.mxu1 %v388_v12  ;;  %v554_v36 = vld [vmem:[#allocation3] sm:$0xff]  ;;  %p1034_p4 = pnand %p1033_p1, %p1240_p0  ;;  %s1038_s14 = scalar_lea.vmem %s1037_s18, 256 }
  0x5a   : > { %846 = vmatmul.mubr.msk.f32.vlgmr.msra.gmra.mxu0 %vm307_vm1, %v295_v13  ;;  %822 = vmatmul.mubr.msk.f32.vlgmr.msra.gmra.mxu1 %vm307_vm1, %v387_v14  ;;  %v571_v47 = vld [vmem:[#allocation4] sm:$0xff]  ;;  %p1039_p10 = scmp.lt.s32.totalorder %s691_s26, %s1037_s18  ;;  %p1040_p5 = scmp.lt.s32.totalorder %s1038_s14, %s1032_s30 }
  0x5b   : > { %848 = vmatprep.subr.mxu0 %v1127_v0  ;;  %853 = vmatprep.subr.mxu1 %v1127_v0  ;;  %p1035_p8 = pneg %p1034_p4 }
  0x5c   : > { %850 = vmatprep.mubr.msk.f32.mxu0 %vm1128_vm0, %v1127_v0  ;;  %855 = vmatprep.mubr.msk.f32.mxu1 %vm1128_vm0, %v1127_v0  ;;  %p1041_p7 = por %p1040_p5, %p1039_p10 }
  0x5d   : > { %942 = vset.pattern.permute.xlu0 %v1130_v35  ;;  %943 = vset.pattern.permute.xlu1 %v1130_v35 }
  0x5e   : > { %p1042_p3 = pnand %p1041_p7, %p1035_p8 }
 0x11a   : > { %v377_v22 = vpop.f32.mrf.mxu0  ;;  %v478_v25 = vpop.f32.mrf.mxu1 }
 0x11b   : > { %v378_v24 = vadd.f32 %v820_v20, %v377_v22  ;;  %v479_v26 = vadd.f32 %v478_v25, %v401_v21 }
 0x11c   : > { %v847_v27 = vpop.f32.mrf.mxu0  ;;  %v480_v29 = vpop.f32.mrf.mxu1 }
 0x11d   : > { %v381_v28 = vmul.f32 0.17677669, %v378_v24  ;;  %v481_v30 = vadd.f32 %v480_v29, %v405_v23  ;;  %849 = vmatpush3.xpose.msra.mxu0 %v479_v26 }
 0x11f   : > { %854 = vmatpush3.msra.mxu1 %v481_v30 }
 0x120   : > { %851 = vmatmul.mubr.f32.vlgmr.msra.gmra.mxu0 %v381_v28 }
 0x1e0   : > { %v550_v32 = vpop.f32.mrf.mxu0 }
 0x1e1   : > { %v556_v33 = vsel %vm555_vm3, %v550_v32, -inf }
 0x1e2   : > { %557 = vmax.xlane.f32.xlu0 %v556_v33  ;;  %v852_v34 = vpop.f32.mrf.mxu0 }
 0x26b   : > { %v558_v37 = vpop.xlane.xlu0 %557 }
 0x26c   : > { %v559_v38 = vmax.f32 %v554_v36, %v558_v37 }
 0x26e   : > { %v560_v39 = vsub.f32 %v554_v36, %v559_v38  ;;  %661 = vst.msk [vmem:[#allocation3] sm:$0xff] %vm383_vm2, %v559_v38  ;;  %565 = vperm.xlu0 %942, %v559_v38  }
 0x270   : > { %v561_v44 = vmul.f32 1.442695, %v560_v39 }
 0x2e9   : > { %v566_v40 = vpop.permute.xlu0 %565 }
 0x2ea   : > { %v568_v41 = vsub.f32 %v550_v32, %v566_v40 }
 0x2ec   : > { %v569_v42 = vmul.f32 1.442695, %v568_v41 }
 0x2ee   : > { %944 = vpow2.f32 %v569_v42 }
 0x2ef   : > { %946 = vpow2.f32 %v561_v44 }
 0x2fb   : > { %v945_v43 = vpop.eup %944 }
 0x2fc   : > { %856 = vmatmul.mubr.msk.f32.vlgmr.msra.gmra.mxu1 %vm555_vm3, %v945_v43  ;;  %v573_v45 = vsel %vm555_vm3, %v945_v43, 0.0  ;;  %v947_v46 = vpop.eup %946 }
 0x2fd   : > { %574 = vadd.xlane.f32.xlu1 %v573_v45  ;;  %v572_v48 = vmul.f32 %v947_v46, %v571_v47 }
 0x30e   : > { %582 = vperm.xlu1 %943, %v947_v46  }
 0x386   : > { %v575_v49 = vpop.xlane.xlu1 %574 }
 0x387   : > { %v576_v50 = vadd.f32 %v575_v49, %v572_v48 }
 0x389   : > { %578 = vst.msk [vmem:[#allocation4] sm:$0xff] %vm383_vm2, %v576_v50 }
 0x38a   : > { %v583_v55 = vpop.permute.xlu1 %582 }
 0x38b   : > { %v585_v56 = vmul.f32 0.0, %v583_v55 }
 0x390   : > { %v665_v51 = vld [vmem:[#allocation4] sm:$0xff] }
 0x391   : > { %948 = vrcp.f32 %v665_v51 }
 0x39e   : > { %v949_v52 = vpop.eup %948 }
 0x39f   : > { %670 = vperm.xlu1 %943, %v949_v52  }
 0x3bc   : > { %v655_v53 = vpop.f32.mrf.mxu1 }
 0x3bd   : > { %v659_v57 = vadd.f32 %v655_v53, %v585_v56 }
 0x3be   : > { %v857_v54 = vpop.f32.mrf.mxu1 }
 0x41a   : > { %v671_v58 = vpop.permute.xlu1 %670 }
 0x41b   : > { %v673_v59 = vmul.f32 %v671_v58, %v659_v57 }
 0x41d   : > { %674 = vst.msk [vmem:[%s290_s13] sm:$0xff] %vm307_vm1, %v673_v59 }
 0x41e   : > { %1045 = shalt.err (!%p1042_p3)
}
 0x41f   : > { %s1046_s25 = scalar_lea.hbm %s688_s28, 128  ;;  %s1050_s9 = scalar_lea.hbm %s1383_s4, 256 }
 0x420   : > { %p1047_p2 = scmp.ne.s32.totalorder %s688_s28, %s1046_s25  ;;  %p1051_p12 = scmp.lt.s32.totalorder %s688_s28, %s1383_s4 }
 0x421   : > { %p1052_p13 = scmp.lt.s32.totalorder %s1050_s9, %s1046_s25 }
 0x422   : > { %p1048_p6 = pnand %p1047_p2, %p1240_p0 }
 0x423   : > { %p1053_p11 = por %p1052_p13, %p1051_p12 }
 0x424   : > { %p1049_p9 = pneg %p1048_p6 }
 0x426   : > { %p1054_p1 = pnand %p1053_p11, %p1049_p9 }
 0x428   : > { %1057 = shalt.err (!%p1054_p1)
}
 0x429   : > { %866 = dma.vmem_to_hbm [thread:$0]  (%p1240_p0), %s691_s26, 128, %s688_s28, %s676_s27  }
 0x42a PF: > { %s702_s12 = sand.u32 1, %s1100_s15   ;;  %p1396_p4 = scmp.ne.s32.totalorder %s1387_s24, 0 }
 0x42b   : > { %p1397_p8 = scmp.ge.s32.totalorder %s1120_s20, 2  ;;  %s703_s5 = scalar_lea.sflag [#allocation8], %s702_s12 }
 0x42d   : > { %p880_p10 = pnand %p1397_p8, %p1396_p4 }
 0x42f   : > { %p881_p5 = pneg %p880_p10 }
 0x431   : > { %1095 = dma.done.wait (%p881_p5), %s703_s5, 128  }
 0x432   : > { %1097 = vsyncadd (%p881_p5), %s703_s5, 4294967168  ;;  %s23_s20 = sadd.s32 1, %s1120_s20   ;;  %s1398_s11 = sld [smem:[#allocation17_spill]] }
 0x433   : > { %p20_p7 = scmp.ge.s32.totalorder %s23_s20, 4   ;;  %s1399_s15 = smov %s1104_s16 }
 0x434   : > { %s1400_s16 = smov %s1108_s17  ;;  %s1401_s17 = smov %s1249_s22 }
 0x435   : > { %s1402_s18 = smov %s1116_s19  ;;  %22 = sbr.rel (!%p20_p7) target bundleno = 10 (0xa), region = 106 }
 0x438   : > { %s1403_s19 = smov %s1398_s11 }
 0x43a   :  { %708 = vsyncpa [#allocation7], 1 }
 0x43b   :  { %710 = vsyncpa [#allocation7 + $0x1], 1 }
 0x43c   :  { %711 = vsyncpa [#allocation10], 1 }
 0x43d   :  { %713 = vsyncpa [#allocation10 + $0x1], 1 }
 0x43e   :  { %714 = vsyncpa [#allocation8], 1 }
 0x43f   :  { %716 = vsyncpa [#allocation8 + $0x1], 1 }

</bundles_post_ra>
